<compile_context>
chip_gen: v7x
topology: tpu7x:2x2x1
jax: 0.10.0
libtpu: 0.0.40
codegen_flags: <defaults>
</compile_context>

<pallas_src>
import jax
import jax.numpy as jnp
from jax import lax
from jax.experimental import pallas as pl
from jax.experimental.pallas import tpu as pltpu

KEEP_PROB = 0.8          # dropout p = 0.2
NUM_SAMPLES = 5
LANE = 128


def _msd_head_kernel(seed_ref, x_ref, w_ref, b_ref, o_ref):
    """seed_ref: SMEM (1,) i32 (scalar prefetch); x_ref: (TB,H) f32; w_ref: (H,Lp) bf16;
    b_ref: (1,Lp) f32; o_ref: (TB,Lp) f32."""
    TB, H = x_ref.shape
    pid = pl.program_id(0)

    x = x_ref[...]                                    # (TB, H) f32
    seed_u = seed_ref[0].astype(jnp.uint32)
    pid_u = pid.astype(jnp.uint32)

    # Unique 32-bit counter per (global row, column).
    row = lax.broadcasted_iota(jnp.int32, (TB, H), 0).astype(jnp.uint32)
    col = lax.broadcasted_iota(jnp.int32, (TB, H), 1).astype(jnp.uint32)
    ctr = (row + pid_u * jnp.uint32(TB)) * jnp.uint32(H) + col
    key = seed_u * jnp.uint32(0x9E3779B1) + jnp.uint32(0x85EBCA77)

    def hash32(v):
        # murmur3-style finalizer: cheap, well-mixed 32-bit hash on the VPU.
        v = v ^ (v >> jnp.uint32(16))
        v = v * jnp.uint32(0x7FEB352D)
        v = v ^ (v >> jnp.uint32(15))
        v = v * jnp.uint32(0x846CA68B)
        v = v ^ (v >> jnp.uint32(16))
        return v

    # Bernoulli(keep_prob) via 16-bit threshold; 3 draws give 6 fields, use 5.
    thresh = jnp.uint32(int(round(KEEP_PROB * 65536.0)))
    mask_cnt = jnp.zeros((TB, H), jnp.uint32)
    n_fields = 0
    d = 0
    while n_fields < NUM_SAMPLES:                     # unrolled at trace time
        bits = hash32(ctr ^ (key + jnp.uint32(d) * jnp.uint32(0x6C8E9CF5)))
        for field in (bits & jnp.uint32(0xFFFF), bits >> jnp.uint32(16)):
            if n_fields < NUM_SAMPLES:
                mask_cnt = mask_cnt + (field < thresh).astype(jnp.uint32)
                n_fields += 1
        d += 1

    # sum_i fc(dropout_i(x)) / 5  ==  ((x * mask_sum) / (keep_prob * 5)) @ W + b
    scale = jnp.float32(1.0 / (KEEP_PROB * NUM_SAMPLES))
    xd = (x * mask_cnt.astype(jnp.float32)) * scale   # fp32 elementwise (v5e-safe)
    out = jnp.dot(xd.astype(jnp.bfloat16), w_ref[...],
                  preferred_element_type=jnp.float32)
    o_ref[...] = out + b_ref[...]


def prepare_head_params(weight, bias):
    """One-time prep of PyTorch-style params: (L,H)->(H,Lp) bf16, bias->(1,Lp) f32."""
    L, H = weight.shape
    Lp = max(LANE, ((L + LANE - 1) // LANE) * LANE)
    w_t = jnp.asarray(weight, jnp.float32).T.astype(jnp.bfloat16)       # (H, L)
    w_pad = jnp.zeros((H, Lp), jnp.bfloat16).at[:, :L].set(w_t)
    b_pad = jnp.zeros((1, Lp), jnp.float32).at[0, :L].set(jnp.asarray(bias, jnp.float32))
    return w_pad, b_pad


def multi_sample_dropout_head(features, w_pad, b_pad, seed, *, num_labels):
    """features: (B,S,H); w_pad: (H,Lp) bf16; b_pad: (1,Lp) f32; seed: int32 array."""
    x = features[:, 0, :].astype(jnp.float32)          # CLS slice (small strided copy)
    B, H = x.shape
    Lp = w_pad.shape[1]

    TB = 256 if B > 256 else B                         # 256-row batch tiles at scale
    Bp = pl.cdiv(B, TB) * TB
    if Bp != B:
        x = jnp.pad(x, ((0, Bp - B), (0, 0)))
    grid = (Bp // TB,)

    seed_arr = jnp.asarray(seed, jnp.int32).reshape((1,))

    out = pl.pallas_call(
        _msd_head_kernel,
        out_shape=jax.ShapeDtypeStruct((Bp, Lp), jnp.float32),
        grid_spec=pltpu.PrefetchScalarGridSpec(
            num_scalar_prefetch=1,
            grid=grid,
            in_specs=[
                pl.BlockSpec((TB, H), lambda i, s: (i, 0)),   # x: batch-tiled
                pl.BlockSpec((H, Lp), lambda i, s: (0, 0)),   # W: VMEM-resident
                pl.BlockSpec((1, Lp), lambda i, s: (0, 0)),   # bias: VMEM-resident
            ],
            out_specs=pl.BlockSpec((TB, Lp), lambda i, s: (i, 0)),
        ),
        compiler_params=pltpu.CompilerParams(
            dimension_semantics=("parallel",)),
    )(seed_arr, x, w_pad, b_pad)

    return out[:B, :num_labels]


if __name__ == "__main__":
    # Small config consistent with the module: hidden_size=32, num_labels=8.
    B, S, H, L = 2, 8, 32, 8

    key = jax.random.PRNGKey(0)
    k_feat, k_w, k_b = jax.random.split(key, 3)

    features = jax.random.normal(k_feat, (B, S, H), dtype=jnp.float32)
    # Deterministic nn.Linear-style init: uniform(-1/sqrt(H), 1/sqrt(H)).
    bound = 1.0 / (H ** 0.5)
    weight = jax.random.uniform(k_w, (L, H), minval=-bound, maxval=bound, dtype=jnp.float32)
    bias = jax.random.uniform(k_b, (L,), minval=-bound, maxval=bound, dtype=jnp.float32)

    w_pad, b_pad = prepare_head_params(weight, bias)       # one-time param prep
    seed = jnp.asarray([1234], jnp.int32)                  # per-step seed, traced array

    logits = multi_sample_dropout_head(features, w_pad, b_pad, seed, num_labels=L)
    jax.block_until_ready(logits)

    assert logits.shape == (B, L)
    assert bool(jnp.all(jnp.isfinite(logits)))
    print("KERNEL_OK")
</pallas_src>

<mosaic_0001>
module attributes {stable_mosaic.version = 11 : i64} {
  func.func @_msd_head_kernel(%arg0: i32, %arg1: memref<1xi32, #tpu.memory_space<smem>>, %arg2: memref<2x32xf32, #tpu.memory_space<vmem>>, %arg3: memref<32x128xbf16, #tpu.memory_space<vmem>>, %arg4: memref<1x128xf32, #tpu.memory_space<vmem>>, %arg5: memref<2x128xf32, #tpu.memory_space<vmem>>) attributes {dimension_semantics = [#tpu.dimension_semantics<parallel>], iteration_bounds = array<i64: 1>, scalar_prefetch = 1 : i64, scratch_operands = 0 : i64, tpu.core_type = #tpu.core_type<tc>, window_params = [{transform_indices = @transform_0, window_bounds = array<i64: 2, 32>}, {pipeline_mode = #tpu.pipeline_mode<synchronous>, transform_indices = @transform_1, window_bounds = array<i64: 32, 128>}, {pipeline_mode = #tpu.pipeline_mode<synchronous>, transform_indices = @transform_2, window_bounds = array<i64: 1, 128>}, {transform_indices = @transform_3, window_bounds = array<i64: 2, 128>}]} {
    %c0 = arith.constant 0 : index
    %c0_0 = arith.constant 0 : index
    %0 = vector.load %arg2[%c0, %c0_0] : memref<2x32xf32, #tpu.memory_space<vmem>>, vector<2x32xf32>
    %c0_1 = arith.constant 0 : index
    %1 = memref.load %arg1[%c0_1] : memref<1xi32, #tpu.memory_space<smem>>
    %2 = tpu.iota {dimensions = array<i32: 0>} : vector<2x32xi32>
    %3 = tpu.iota {dimensions = array<i32: 1>} : vector<2x32xi32>
    %c2_i32 = arith.constant 2 : i32
    %4 = arith.muli %arg0, %c2_i32 : i32
    %5 = vector.broadcast %4 : i32 to vector<2x32xi32>
    %6 = arith.addi %2, %5 : vector<2x32xi32>
    %c32_i32 = arith.constant 32 : i32
    %7 = vector.broadcast %c32_i32 : i32 to vector<2x32xi32>
    %8 = arith.muli %6, %7 : vector<2x32xi32>
    %9 = arith.addi %8, %3 : vector<2x32xi32>
    %c-1640531535_i32 = arith.constant -1640531535 : i32
    %10 = arith.muli %1, %c-1640531535_i32 : i32
    %c-2048144777_i32 = arith.constant -2048144777 : i32
    %11 = arith.addi %10, %c-2048144777_i32 : i32
    %c0_i32 = arith.constant 0 : i32
    %12 = vector.broadcast %c0_i32 : i32 to vector<2x32xi32>
    %c0_i32_2 = arith.constant 0 : i32
    %c1821285621_i32 = arith.constant 1821285621 : i32
    %13 = arith.muli %c0_i32_2, %c1821285621_i32 : i32
    %14 = arith.addi %11, %13 : i32
    %15 = vector.broadcast %14 : i32 to vector<2x32xi32>
    %16 = arith.xori %9, %15 : vector<2x32xi32>
    %c16_i32 = arith.constant 16 : i32
    %17 = vector.broadcast %c16_i32 : i32 to vector<2x32xi32>
    %18 = arith.shrui %16, %17 : vector<2x32xi32>
    %19 = arith.xori %16, %18 : vector<2x32xi32>
    %c2146121005_i32 = arith.constant 2146121005 : i32
    %20 = vector.broadcast %c2146121005_i32 : i32 to vector<2x32xi32>
    %21 = arith.muli %19, %20 : vector<2x32xi32>
    %c15_i32 = arith.constant 15 : i32
    %22 = vector.broadcast %c15_i32 : i32 to vector<2x32xi32>
    %23 = arith.shrui %21, %22 : vector<2x32xi32>
    %24 = arith.xori %21, %23 : vector<2x32xi32>
    %c-2073254261_i32 = arith.constant -2073254261 : i32
    %25 = vector.broadcast %c-2073254261_i32 : i32 to vector<2x32xi32>
    %26 = arith.muli %24, %25 : vector<2x32xi32>
    %c16_i32_3 = arith.constant 16 : i32
    %27 = vector.broadcast %c16_i32_3 : i32 to vector<2x32xi32>
    %28 = arith.shrui %26, %27 : vector<2x32xi32>
    %29 = arith.xori %26, %28 : vector<2x32xi32>
    %c65535_i32 = arith.constant 65535 : i32
    %30 = vector.broadcast %c65535_i32 : i32 to vector<2x32xi32>
    %31 = arith.andi %29, %30 : vector<2x32xi32>
    %c16_i32_4 = arith.constant 16 : i32
    %32 = vector.broadcast %c16_i32_4 : i32 to vector<2x32xi32>
    %33 = arith.shrui %29, %32 : vector<2x32xi32>
    %c52429_i32 = arith.constant 52429 : i32
    %34 = vector.broadcast %c52429_i32 : i32 to vector<2x32xi32>
    %35 = arith.cmpi ult, %31, %34 : vector<2x32xi32>
    %36 = arith.extui %35 : vector<2x32xi1> to vector<2x32xi32>
    %37 = arith.addi %12, %36 : vector<2x32xi32>
    %c52429_i32_5 = arith.constant 52429 : i32
    %38 = vector.broadcast %c52429_i32_5 : i32 to vector<2x32xi32>
    %39 = arith.cmpi ult, %33, %38 : vector<2x32xi32>
    %40 = arith.extui %39 : vector<2x32xi1> to vector<2x32xi32>
    %41 = arith.addi %37, %40 : vector<2x32xi32>
    %c1_i32 = arith.constant 1 : i32
    %c1821285621_i32_6 = arith.constant 1821285621 : i32
    %42 = arith.muli %c1_i32, %c1821285621_i32_6 : i32
    %43 = arith.addi %11, %42 : i32
    %44 = vector.broadcast %43 : i32 to vector<2x32xi32>
    %45 = arith.xori %9, %44 : vector<2x32xi32>
    %c16_i32_7 = arith.constant 16 : i32
    %46 = vector.broadcast %c16_i32_7 : i32 to vector<2x32xi32>
    %47 = arith.shrui %45, %46 : vector<2x32xi32>
    %48 = arith.xori %45, %47 : vector<2x32xi32>
    %c2146121005_i32_8 = arith.constant 2146121005 : i32
    %49 = vector.broadcast %c2146121005_i32_8 : i32 to vector<2x32xi32>
    %50 = arith.muli %48, %49 : vector<2x32xi32>
    %c15_i32_9 = arith.constant 15 : i32
    %51 = vector.broadcast %c15_i32_9 : i32 to vector<2x32xi32>
    %52 = arith.shrui %50, %51 : vector<2x32xi32>
    %53 = arith.xori %50, %52 : vector<2x32xi32>
    %c-2073254261_i32_10 = arith.constant -2073254261 : i32
    %54 = vector.broadcast %c-2073254261_i32_10 : i32 to vector<2x32xi32>
    %55 = arith.muli %53, %54 : vector<2x32xi32>
    %c16_i32_11 = arith.constant 16 : i32
    %56 = vector.broadcast %c16_i32_11 : i32 to vector<2x32xi32>
    %57 = arith.shrui %55, %56 : vector<2x32xi32>
    %58 = arith.xori %55, %57 : vector<2x32xi32>
    %c65535_i32_12 = arith.constant 65535 : i32
    %59 = vector.broadcast %c65535_i32_12 : i32 to vector<2x32xi32>
    %60 = arith.andi %58, %59 : vector<2x32xi32>
    %c16_i32_13 = arith.constant 16 : i32
    %61 = vector.broadcast %c16_i32_13 : i32 to vector<2x32xi32>
    %62 = arith.shrui %58, %61 : vector<2x32xi32>
    %c52429_i32_14 = arith.constant 52429 : i32
    %63 = vector.broadcast %c52429_i32_14 : i32 to vector<2x32xi32>
    %64 = arith.cmpi ult, %60, %63 : vector<2x32xi32>
    %65 = arith.extui %64 : vector<2x32xi1> to vector<2x32xi32>
    %66 = arith.addi %41, %65 : vector<2x32xi32>
    %c52429_i32_15 = arith.constant 52429 : i32
    %67 = vector.broadcast %c52429_i32_15 : i32 to vector<2x32xi32>
    %68 = arith.cmpi ult, %62, %67 : vector<2x32xi32>
    %69 = arith.extui %68 : vector<2x32xi1> to vector<2x32xi32>
    %70 = arith.addi %66, %69 : vector<2x32xi32>
    %c2_i32_16 = arith.constant 2 : i32
    %c1821285621_i32_17 = arith.constant 1821285621 : i32
    %71 = arith.muli %c2_i32_16, %c1821285621_i32_17 : i32
    %72 = arith.addi %11, %71 : i32
    %73 = vector.broadcast %72 : i32 to vector<2x32xi32>
    %74 = arith.xori %9, %73 : vector<2x32xi32>
    %c16_i32_18 = arith.constant 16 : i32
    %75 = vector.broadcast %c16_i32_18 : i32 to vector<2x32xi32>
    %76 = arith.shrui %74, %75 : vector<2x32xi32>
    %77 = arith.xori %74, %76 : vector<2x32xi32>
    %c2146121005_i32_19 = arith.constant 2146121005 : i32
    %78 = vector.broadcast %c2146121005_i32_19 : i32 to vector<2x32xi32>
    %79 = arith.muli %77, %78 : vector<2x32xi32>
    %c15_i32_20 = arith.constant 15 : i32
    %80 = vector.broadcast %c15_i32_20 : i32 to vector<2x32xi32>
    %81 = arith.shrui %79, %80 : vector<2x32xi32>
    %82 = arith.xori %79, %81 : vector<2x32xi32>
    %c-2073254261_i32_21 = arith.constant -2073254261 : i32
    %83 = vector.broadcast %c-2073254261_i32_21 : i32 to vector<2x32xi32>
    %84 = arith.muli %82, %83 : vector<2x32xi32>
    %c16_i32_22 = arith.constant 16 : i32
    %85 = vector.broadcast %c16_i32_22 : i32 to vector<2x32xi32>
    %86 = arith.shrui %84, %85 : vector<2x32xi32>
    %87 = arith.xori %84, %86 : vector<2x32xi32>
    %c65535_i32_23 = arith.constant 65535 : i32
    %88 = vector.broadcast %c65535_i32_23 : i32 to vector<2x32xi32>
    %89 = arith.andi %87, %88 : vector<2x32xi32>
    %c52429_i32_24 = arith.constant 52429 : i32
    %90 = vector.broadcast %c52429_i32_24 : i32 to vector<2x32xi32>
    %91 = arith.cmpi ult, %89, %90 : vector<2x32xi32>
    %92 = arith.extui %91 : vector<2x32xi1> to vector<2x32xi32>
    %93 = arith.addi %70, %92 : vector<2x32xi32>
    %94 = arith.uitofp %93 : vector<2x32xi32> to vector<2x32xf32>
    %95 = arith.mulf %0, %94 : vector<2x32xf32>
    %cst = arith.constant 2.500000e-01 : f32
    %96 = vector.broadcast %cst : f32 to vector<2x32xf32>
    %97 = arith.mulf %95, %96 : vector<2x32xf32>
    %98 = arith.truncf %97 : vector<2x32xf32> to vector<2x32xbf16>
    %c0_25 = arith.constant 0 : index
    %c0_26 = arith.constant 0 : index
    %99 = vector.load %arg3[%c0_25, %c0_26] : memref<32x128xbf16, #tpu.memory_space<vmem>>, vector<32x128xbf16>
    %cst_27 = arith.constant dense<0.000000e+00> : vector<2x128xf32>
    %100 = tpu.matmul %98, %99, %cst_27 {dimension_numbers = #tpu.dot_dimension_numbers<[1], [0], [0], [1], [0, 0, 1, 1], [], []>} : vector<2x32xbf16>, vector<32x128xbf16>, vector<2x128xf32> -> vector<2x128xf32>
    %c0_28 = arith.constant 0 : index
    %c0_29 = arith.constant 0 : index
    %101 = vector.load %arg4[%c0_28, %c0_29] : memref<1x128xf32, #tpu.memory_space<vmem>>, vector<1x128xf32>
    %102 = vector.broadcast %101 : vector<1x128xf32> to vector<2x128xf32>
    %103 = arith.addf %100, %102 : vector<2x128xf32>
    %c0_30 = arith.constant 0 : index
    %c0_31 = arith.constant 0 : index
    %104 = vector.load %arg5[%c0_30, %c0_31] : memref<2x128xf32, #tpu.memory_space<vmem>>, vector<2x128xf32>
    tpu.vector_store %arg5[%c0_30, %c0_31], %103 {strides = array<i32>} : memref<2x128xf32, #tpu.memory_space<vmem>>, vector<2x128xf32>,
    return
  }
  func.func @transform_0(%arg0: i32, %arg1: memref<1xi32, #tpu.memory_space<smem>>) -> (i32, i32) {
    %c0_i32 = arith.constant 0 : i32
    %c0_i32_0 = arith.constant 0 : i32
    return %arg0, %c0_i32 : i32, i32
  }
  func.func @transform_1(%arg0: i32, %arg1: memref<1xi32, #tpu.memory_space<smem>>) -> (i32, i32) {
    %c0_i32 = arith.constant 0 : i32
    %c0_i32_0 = arith.constant 0 : i32
    %c0_i32_1 = arith.constant 0 : i32
    return %c0_i32, %c0_i32_0 : i32, i32
  }
  func.func @transform_2(%arg0: i32, %arg1: memref<1xi32, #tpu.memory_space<smem>>) -> (i32, i32) {
    %c0_i32 = arith.constant 0 : i32
    %c0_i32_0 = arith.constant 0 : i32
    %c0_i32_1 = arith.constant 0 : i32
    return %c0_i32, %c0_i32_0 : i32, i32
  }
  func.func @transform_3(%arg0: i32, %arg1: memref<1xi32, #tpu.memory_space<smem>>) -> (i32, i32) {
    %c0_i32 = arith.constant 0 : i32
    %c0_i32_0 = arith.constant 0 : i32
    return %arg0, %c0_i32 : i32, i32
  }
}

</mosaic_0001>

<bundles_post_ra>
// kernel: tpu_custom_call.1
= control target key start
LH: loop header
LB: loop body
LE: loop exit
PB: predicated region body
PF: predicated region fallthrough
CT: control target
= control target key end

     0   :  { %10 = vsyncpa [#allocation5], 0  ;;  %s325_s0 = inlined_call_operand.<no memory space> [shape: s32[1], index: 0, kind: input, shape index: {}]   ;;  %s326_s1 = inlined_call_operand.vmem [shape: f32[2,32], index: 1, kind: input, shape index: {}]   ;;  %s327_s2 = inlined_call_operand.hbm [shape: bf16[32,128], index: 2, kind: input, shape index: {}]   ;;  %s328_s3 = inlined_call_operand.vmem [shape: f32[1,128], index: 3, kind: input, shape index: {}]   ;;  %s329_s4 = inlined_call_operand.hbm [shape: f32[2,128], index: 4, kind: output, shape index: {}]  }
   0x1   :  { %11 = vsyncpa [#allocation6], 0  ;;  %s260_s15 = smov [#allocation4]   ;;  %s212_s19 = scalar_lea.hbm %s327_s2, 256 }
   0x2   :  { %s19_s16 = sshll.u32 %s260_s15, 4  ;;  %p213_p0 = scmp.ne.s32.totalorder %s327_s2, %s212_s19  ;;  %s20_s16 = int_to_ptr.vmem [resolvable:$true] %s19_s16 }
   0x3   :  { %p216_p1 = scmp.lt.u32.totalorder %s212_s19, %s327_s2 }
   0x5   :  { %p218_p2 = pnand %p216_p1, %p213_p0 }
   0x7   :  { %221 = shalt.err (!%p218_p2)
}
   0x8   :  { %s222_s24 = scalar_lea.vmem %s20_s16, 256  ;;  %p227_p4 = scmp.lt.s32.totalorder %s20_s16, %s20_s16 }
   0x9   :  { %p223_p3 = scmp.ne.s32.totalorder %s20_s16, %s222_s24  ;;  %p228_p5 = scmp.lt.s32.totalorder %s222_s24, %s222_s24 }
   0xb   :  { %p229_p6 = por %p228_p5, %p227_p4 }
   0xd   :  { %p230_p7 = pnand %p229_p6, %p223_p3 }
   0xf   :  { %233 = shalt.err (!%p230_p7)
}
  0x10   :  { %s261_s25 = smov 64   ;;  %s262_s26 = smov 4  }
  0x11   :  { %25 = dma.hbm_to_vmem [thread:$0]  %s327_s2, 256, %s20_s16, [#allocation5], %s261_s25, %s261_s25, %s262_s26  }
  0x12   :  { %256 = dma.done.wait [#allocation5], 256  }
  0x13   :  { %257 = vsyncadd [#allocation5], 4294967040  ;;  %v34_v0 = vlaneseq  ;;  %s43_s5 = smul.u32 2654435761, %s325_s0  ;;  %v263_v1 = vmov 0.0   ;;  %vm264_vm0 = vmmov 0  }
  0x14   :  { %195 = vmatprep.subr.bf16.mxu0 %v263_v1  ;;  %199 = vmatprep.mubr.msk.bf16.mxu0 %vm264_vm0, %v263_v1  ;;  %v210_v9 = vld [vmem:[#allocation4] sm:$0xff]   ;;  %v211_v13 = vld [vmem:[#allocation4 + $0x8] sm:$0xff]   ;;  %v265_v43 = vmov 0   ;;  %vm128_vm6 = vcmask 261120   ;;  %s266_s11 = smov [#allocation7]  }
  0x15   :  { %v35_v2 = vshrl.u32 %v34_v0, 7  ;;  %v37_v3 = vand.u32 127, %v34_v0  ;;  %s44_s6 = sadd.s32 2246822519, %s43_s5  ;;  %s62_s7 = sadd.s32 4068108140, %s43_s5  ;;  %196 = vmatpush3.bf16.msra.mxu0 %v210_v9 }
  0x16   :  { %s81_s8 = sadd.s32 1594426465, %s43_s5  ;;  %v45_v5 = vstv %s44_s6  ;;  %v63_v6 = vstv %s62_s7  ;;  %197 = vmatprep.subr.bf16.mxu0 %v263_v1  ;;  %v32_v58 = vld [vmem:[%s326_s1] sm:$0x3]  ;;  %s179_s12 = sshll.u32 %s266_s11, 4  ;;  %s180_s12 = int_to_ptr.vmem [resolvable:$true] %s179_s12 }
  0x17   :  { %v41_v4 = vmul.u32 32, %v35_v2  ;;  %v82_v7 = vstv %s81_s8  ;;  %v188_v63 = vld [vmem:[%s328_s3] ss:$0 sm:$0xff]  ;;  %s234_s1 = scalar_lea.vmem %s180_s12, 32  ;;  %p239_p9 = scmp.lt.s32.totalorder %s180_s12, %s180_s12 }
  0x18   :  { %p235_p8 = scmp.ne.s32.totalorder %s180_s12, %s234_s1  ;;  %p240_p10 = scmp.lt.s32.totalorder %s234_s1, %s234_s1 }
  0x19   :  { %v42_v8 = vadd.s32 %v41_v4, %v37_v3  ;;  %198 = vmatpush3.bf16.msra.mxu0 %v211_v13 }
  0x1a   :  { %p241_p11 = por %p240_p10, %p239_p9 }
  0x1b   :  { %v46_v10 = vxor.u32 %v45_v5, %v42_v8  ;;  %v64_v11 = vxor.u32 %v63_v6, %v42_v8  ;;  %v83_v12 = vxor.u32 %v82_v7, %v42_v8 }
  0x1c   :  { %p242_p12 = pnand %p241_p11, %p235_p8 }
  0x1d   :  { %v47_v14 = vshrl.u32 %v46_v10, 16  ;;  %v65_v15 = vshrl.u32 %v64_v11, 16  ;;  %v84_v16 = vshrl.u32 %v83_v12, 16 }
  0x1f   :  { %v48_v17 = vxor.u32 %v47_v14, %v46_v10  ;;  %v66_v18 = vxor.u32 %v65_v15, %v64_v11  ;;  %v85_v19 = vxor.u32 %v84_v16, %v83_v12 }
  0x21   :  { %v49_v20 = vmul.u32 2146121005, %v48_v17  ;;  %v67_v21 = vmul.u32 2146121005, %v66_v18 }
  0x22   :  { %v86_v22 = vmul.u32 2146121005, %v85_v19 }
  0x23   :  { %v50_v23 = vshrl.u32 %v49_v20, 15  ;;  %v68_v24 = vshrl.u32 %v67_v21, 15 }
  0x24   :  { %v87_v25 = vshrl.u32 %v86_v22, 15 }
  0x25   :  { %v51_v26 = vxor.u32 %v50_v23, %v49_v20  ;;  %v69_v27 = vxor.u32 %v68_v24, %v67_v21 }
  0x26   :  { %v88_v28 = vxor.u32 %v87_v25, %v86_v22 }
  0x27   :  { %v52_v29 = vmul.u32 2221713035, %v51_v26  ;;  %v70_v30 = vmul.u32 2221713035, %v69_v27 }
  0x28   :  { %v89_v31 = vmul.u32 2221713035, %v88_v28 }
  0x29   :  { %v53_v32 = vshrl.u32 %v52_v29, 16  ;;  %v71_v33 = vshrl.u32 %v70_v30, 16 }
  0x2a   :  { %v90_v34 = vshrl.u32 %v89_v31, 16 }
  0x2b   :  { %v54_v35 = vxor.u32 %v53_v32, %v52_v29  ;;  %v72_v36 = vxor.u32 %v71_v33, %v70_v30 }
  0x2c   :  { %v91_v37 = vxor.u32 %v90_v34, %v89_v31 }
  0x2d   :  { %v55_v38 = vand.u32 65535, %v54_v35  ;;  %v56_v39 = vshrl.u32 %v54_v35, 16  ;;  %v73_v40 = vand.u32 65535, %v72_v36  ;;  %v74_v41 = vshrl.u32 %v72_v36, 16 }
  0x2e   :  { %v92_v42 = vand.u32 65535, %v91_v37 }
  0x2f   :  { %vm57_vm1 = vcmp.lt.u32.totalorder %v55_v38, 52429  ;;  %vm59_vm2 = vcmp.lt.u32.totalorder %v56_v39, 52429  ;;  %vm75_vm3 = vcmp.lt.u32.totalorder %v73_v40, 52429  ;;  %vm78_vm4 = vcmp.lt.u32.totalorder %v74_v41, 52429 }
  0x30   :  { %v58_v44 = vsel %vm57_vm1, 1, %v265_v43  ;;  %v60_v45 = vsel %vm59_vm2, 1, %v265_v43  ;;  %v76_v46 = vsel %vm75_vm3, 1, %v265_v43  ;;  %vm93_vm5 = vcmp.lt.u32.totalorder %v92_v42, 52429 }
  0x31   :  { %v61_v47 = vadd.s32 %v60_v45, %v58_v44  ;;  %v79_v48 = vsel %vm78_vm4, 1, %v265_v43  ;;  %v94_v50 = vsel %vm93_vm5, 1, %v265_v43 }
  0x33   :  { %v77_v49 = vadd.s32 %v76_v46, %v61_v47 }
  0x35   :  { %v80_v51 = vadd.s32 %v79_v48, %v77_v49 }
  0x37   :  { %v95_v52 = vadd.s32 %v94_v50, %v80_v51 }
  0x39   :  { %v96_v53 = vshrl.u32 %v95_v52, 16  ;;  %v97_v54 = vand.u32 65535, %v95_v52 }
  0x3b   :  { %v98_v55 = vcvt.s32.f32 %v96_v53  ;;  %v100_v56 = vcvt.s32.f32 %v97_v54 }
  0x3d   :  { %v99_v57 = vmul.f32 65536.0, %v98_v55 }
  0x3f   :  { %v101_v59 = vadd.f32 %v100_v56, %v99_v57 }
  0x41   :  { %v102_v60 = vmul.f32 %v101_v59, %v32_v58 }
  0x43   :  { %v103_v61 = vmul.f32 0.25, %v102_v60 }
  0x45   :  { %v104_v62 = vpack.c.bf16 %v103_v61, %v103_v61 }
  0x47   :  { %200 = vmatmul.mubr.msk.bf16.vlgmr.msra.gmra.mrb[0].mxu0 %vm128_vm6, %v104_v62 }
 0x11a   :  { %v166_v0 = vpop.f32.mrb[0].mxu0 }
 0x11b   :  { %v167_v1 = vadd.f32 %v188_v63, %v166_v0  ;;  %v201_v2 = vpop.f32.mrb[1].mxu0 }
 0x11c   :  { %v169_v3 = vpop.f32.mrb[2].mxu0 }
 0x11d   :  { %172 = vst [vmem:[#allocation7] sm:$0x3] %v167_v1  ;;  %v202_v4 = vpop.f32.mrb[3].mxu0 }
 0x11e   :  { %245 = shalt.err (!%p242_p12)
}
 0x11f   :  { %s246_s3 = scalar_lea.hbm %s329_s4, 32 }
 0x120   :  { %p247_p13 = scmp.ne.s32.totalorder %s329_s4, %s246_s3  ;;  %p250_p0 = scmp.lt.u32.totalorder %s246_s3, %s329_s4 }
 0x122   :  { %p252_p1 = pnand %p250_p0, %p247_p13 }
 0x124   :  { %255 = shalt.err (!%p252_p1)
}
 0x125   :  { %182 = dma.vmem_to_hbm [thread:$0]  %s180_s12, 32, %s329_s4, [#allocation6]  }
 0x126   :  { %258 = dma.done.wait [#allocation6], 32  }
 0x127   :  { %259 = vsyncadd [#allocation6], 4294967264 }
 0x128   :  { %186 = vsyncpa [#allocation5], 1 }
 0x129   :  { %187 = vsyncpa [#allocation6], 1 }

</bundles_post_ra>
